<compile_context>
chip_gen: v6e
topology: v6e:2x2x1
jax: 0.10.0
libtpu: 0.0.40
codegen_flags: <defaults>
</compile_context>

<pallas_src>
import functools
from math import sqrt

import jax
import jax.numpy as jnp
from jax.experimental import pallas as pl
from jax.experimental.pallas import tpu as pltpu


def _round_up(x, m):
    return ((x + m - 1) // m) * m


def _conv_tap_lrelu_kernel(x_ref, w_ref, b_ref, out_ref, *,
                           kh_kw, w_pad, tile, tile_in, neg_slope):
    # x_ref:   (C_in, L_in)           flat padded activations, resident per batch (bf16)
    # w_ref:   (KH*KW, C_out, C_in)   pre-scaled weight taps, resident (bf16)
    # b_ref:   (C_out, 1)             bias, resident (f32)
    # out_ref: (C_out, TILE)          lane-dense output tile
    KH, KW = kh_kw
    t = pl.program_id(1)
    base = pl.multiple_of(t * tile, 128)
    chunk = x_ref[:, pl.ds(base, tile_in)]                 # (C_in, tile_in)

    c_out = out_ref.shape[0]
    acc = jnp.zeros((c_out, tile), jnp.float32)
    for kh in range(KH):                                   # static, unrolled
        for kw in range(KW):
            off = kh * w_pad + kw                          # static flat shift
            tap = w_ref[kh * KW + kw]                      # (C_out, C_in)
            acc = acc + jnp.dot(tap, chunk[:, off:off + tile],
                                preferred_element_type=jnp.float32)

    y = acc + b_ref[...]                                   # f32 bias add
    y = jnp.where(y >= 0, y, neg_slope * y)                # LeakyReLU(0.2), f32
    out_ref[...] = y.astype(out_ref.dtype)


def equal_conv2d_lrelu(x, weight, bias, padding, *, neg_slope=0.2,
                       out_dtype=None, tile_hw=512):
    """EqualConv2d (weight * sqrt(2/fan_in) + bias) followed by LeakyReLU. NCHW."""
    N, C_in, H, W = x.shape
    C_out, C_in_w, KH, KW = weight.shape
    assert C_in_w == C_in
    assert tile_hw % 128 == 0
    if out_dtype is None:
        out_dtype = x.dtype

    fan_in = C_in * KH * KW
    scale = sqrt(2.0 / fan_in)

    H_pad, W_pad = H + 2 * padding, W + 2 * padding
    H_out, W_out = H_pad - (KH - 1), W_pad - (KW - 1)

    # Flat output index space i = h*W_pad + w (w >= W_out columns are cropped later).
    L_out = H_out * W_pad
    tile = min(tile_hw, _round_up(L_out, 128))
    n_tiles = (L_out + tile - 1) // tile
    L_out_padded = n_tiles * tile
    halo = (KH - 1) * W_pad + (KW - 1)
    tile_in = tile + _round_up(halo, 128)
    L_in = _round_up(max(H_pad * W_pad, (n_tiles - 1) * tile + tile_in), 128)

    # Wrapper-side layout plumbing (fused by XLA under jit): pad, flatten, bf16.
    x_pad = jnp.pad(x, ((0, 0), (0, 0), (padding, padding), (padding, padding)))
    x_flat = x_pad.reshape(N, C_in, H_pad * W_pad)
    x_flat = jnp.pad(x_flat, ((0, 0), (0, 0), (0, L_in - H_pad * W_pad)))
    x_flat = x_flat.astype(jnp.bfloat16)

    # Equal-LR scale folded into the (tiny) weight; taps laid out (KH*KW, C_out, C_in).
    w_taps = (jnp.transpose(weight, (2, 3, 0, 1)).reshape(KH * KW, C_out, C_in)
              * scale).astype(jnp.bfloat16)
    b2d = bias.astype(jnp.float32).reshape(C_out, 1)

    kernel = functools.partial(
        _conv_tap_lrelu_kernel, kh_kw=(KH, KW), w_pad=W_pad,
        tile=tile, tile_in=tile_in, neg_slope=neg_slope)

    out_bytes = jnp.dtype(out_dtype).itemsize
    cost = pl.CostEstimate(
        flops=2 * N * C_out * C_in * KH * KW * L_out_padded,
        transcendentals=0,
        bytes_accessed=(N * C_in * L_in * 2 + KH * KW * C_out * C_in * 2
                        + C_out * 4 + N * C_out * L_out_padded * out_bytes))

    out_flat = pl.pallas_call(
        kernel,
        out_shape=jax.ShapeDtypeStruct((N, C_out, L_out_padded), out_dtype),
        grid_spec=pltpu.PrefetchScalarGridSpec(
            num_scalar_prefetch=0,
            grid=(N, n_tiles),
            in_specs=[
                # Flat activations: constant along the tile axis -> resident per batch.
                pl.BlockSpec((None, C_in, L_in), lambda n, t: (n, 0, 0)),
                # Weight taps / bias: resident across the whole grid.
                pl.BlockSpec((KH * KW, C_out, C_in), lambda n, t: (0, 0, 0)),
                pl.BlockSpec((C_out, 1), lambda n, t: (0, 0)),
            ],
            out_specs=pl.BlockSpec((None, C_out, tile), lambda n, t: (n, 0, t)),
        ),
        compiler_params=pltpu.CompilerParams(
            dimension_semantics=("parallel", "parallel")),
        cost_estimate=cost,
    )(x_flat, w_taps, b2d)

    # Crop the padded flat index space back to (N, C_out, H_out, W_out).
    out = out_flat[:, :, :L_out].reshape(N, C_out, H_out, W_pad)[:, :, :, :W_out]
    return out


def conv_block_forward(x, w1, b1, w2, b2, padding1, padding2, tile_hw=512):
    """ConvBlock.forward for the default (downsample=False) configuration."""
    h = equal_conv2d_lrelu(x, w1, b1, padding1,
                           out_dtype=jnp.bfloat16, tile_hw=tile_hw)
    out = equal_conv2d_lrelu(h, w2, b2, padding2,
                             out_dtype=x.dtype, tile_hw=tile_hw)
    return out


if __name__ == "__main__":
    key = jax.random.PRNGKey(0)
    k_w1, k_w2, k_b1, k_b2, k_x = jax.random.split(key, 5)

    batch, in_channel, out_channel = 2, 4, 8
    size, ksize, pad = 16, 3, 1

    # EqualConv2d init: weight ~ N(0,1); bias is zero-init in the PyTorch module,
    # use small non-zero values here to exercise the bias path (same forward math).
    w1 = jax.random.normal(k_w1, (out_channel, in_channel, ksize, ksize), jnp.float32)
    b1 = 0.1 * jax.random.normal(k_b1, (out_channel,), jnp.float32)
    w2 = jax.random.normal(k_w2, (out_channel, out_channel, ksize, ksize), jnp.float32)
    b2 = 0.1 * jax.random.normal(k_b2, (out_channel,), jnp.float32)

    x = jax.random.normal(k_x, (batch, in_channel, size, size), jnp.float32)

    fwd = jax.jit(functools.partial(conv_block_forward, padding1=pad, padding2=pad,
                                    tile_hw=256))
    out = jax.block_until_ready(fwd(x, w1, b1, w2, b2))

    # Pure-JAX reference (lax conv) with matching bf16 input/weight quantization
    # and f32 accumulation.
    def ref_layer(xi, w, b, p, out_dtype):
        s = sqrt(2.0 / (w.shape[1] * w.shape[2] * w.shape[3]))
        xq = xi.astype(jnp.bfloat16).astype(jnp.float32)
        wq = (w * s).astype(jnp.bfloat16).astype(jnp.float32)
        y = jax.lax.conv_general_dilated(
            xq, wq, window_strides=(1, 1), padding=((p, p), (p, p)),
            dimension_numbers=("NCHW", "OIHW", "NCHW"))
        y = y + b.reshape(1, -1, 1, 1)
        y = jnp.where(y >= 0, y, 0.2 * y)
        return y.astype(out_dtype)

    ref = ref_layer(ref_layer(x, w1, b1, pad, jnp.bfloat16), w2, b2, pad, x.dtype)

    assert out.shape == (batch, out_channel, size, size)
    assert out.dtype == x.dtype
    err = float(jnp.max(jnp.abs(out - ref)))
    assert bool(jnp.allclose(out, ref, atol=1e-2, rtol=1e-2)), err

    print("KERNEL_OK")
</pallas_src>

<mosaic_0001>
module attributes {stable_mosaic.version = 11 : i64} {
  func.func @_conv_tap_lrelu_kernel(%arg0: i32, %arg1: i32, %arg2: memref<1x4x640xbf16, #tpu.memory_space<vmem>>, %arg3: memref<9x8x4xbf16, #tpu.memory_space<vmem>>, %arg4: memref<8x1xf32, #tpu.memory_space<vmem>>, %arg5: memref<1x8x256xbf16, #tpu.memory_space<vmem>>) attributes {dimension_semantics = [#tpu.dimension_semantics<parallel>, #tpu.dimension_semantics<parallel>], iteration_bounds = array<i64: 2, 2>, scalar_prefetch = 0 : i64, scratch_operands = 0 : i64, tpu.core_type = #tpu.core_type<tc>, window_params = [{transform_indices = @transform_0, window_bounds = array<i64: 1, 4, 640>}, {pipeline_mode = #tpu.pipeline_mode<synchronous>, transform_indices = @transform_1, window_bounds = array<i64: 9, 8, 4>}, {pipeline_mode = #tpu.pipeline_mode<synchronous>, transform_indices = @transform_2, window_bounds = array<i64: 8, 1>}, {transform_indices = @transform_3, window_bounds = array<i64: 1, 8, 256>}]} {
    %c256_i32 = arith.constant 256 : i32
    %0 = arith.muli %arg1, %c256_i32 : i32
    %1 = tpu.assume_multiple %0, 128 : i32
    %c0 = arith.constant 0 : index
    %c0_0 = arith.constant 0 : index
    %2 = arith.index_cast %1 : i32 to index
    %3 = vector.load %arg2[%c0, %c0_0, %2] : memref<1x4x640xbf16, #tpu.memory_space<vmem>>, vector<1x4x384xbf16>
    %4 = vector.shape_cast %3 : vector<1x4x384xbf16> to vector<4x384xbf16>
    %cst = arith.constant 0.000000e+00 : f32
    %5 = vector.broadcast %cst : f32 to vector<8x256xf32>
    %c0_1 = arith.constant 0 : index
    %c0_2 = arith.constant 0 : index
    %c0_3 = arith.constant 0 : index
    %6 = vector.load %arg3[%c0_1, %c0_2, %c0_3] : memref<9x8x4xbf16, #tpu.memory_space<vmem>>, vector<1x8x4xbf16>
    %7 = vector.shape_cast %6 : vector<1x8x4xbf16> to vector<8x4xbf16>
    %8 = vector.extract_strided_slice %4 {offsets = [0, 0], sizes = [4, 256], strides = [1, 1]} : vector<4x384xbf16> to vector<4x256xbf16>
    %cst_4 = arith.constant dense<0.000000e+00> : vector<8x256xf32>
    %9 = tpu.matmul %7, %8, %cst_4 {dimension_numbers = #tpu.dot_dimension_numbers<[1], [0], [0], [1], [0, 0, 1, 1], [], []>} : vector<8x4xbf16>, vector<4x256xbf16>, vector<8x256xf32> -> vector<8x256xf32>
    %10 = arith.addf %5, %9 : vector<8x256xf32>
    %c1 = arith.constant 1 : index
    %c0_5 = arith.constant 0 : index
    %c0_6 = arith.constant 0 : index
    %11 = vector.load %arg3[%c1, %c0_5, %c0_6] : memref<9x8x4xbf16, #tpu.memory_space<vmem>>, vector<1x8x4xbf16>
    %12 = vector.shape_cast %11 : vector<1x8x4xbf16> to vector<8x4xbf16>
    %13 = vector.extract_strided_slice %4 {offsets = [0, 1], sizes = [4, 256], strides = [1, 1]} : vector<4x384xbf16> to vector<4x256xbf16>
    %cst_7 = arith.constant dense<0.000000e+00> : vector<8x256xf32>
    %14 = tpu.matmul %12, %13, %cst_7 {dimension_numbers = #tpu.dot_dimension_numbers<[1], [0], [0], [1], [0, 0, 1, 1], [], []>} : vector<8x4xbf16>, vector<4x256xbf16>, vector<8x256xf32> -> vector<8x256xf32>
    %15 = arith.addf %10, %14 : vector<8x256xf32>
    %c2 = arith.constant 2 : index
    %c0_8 = arith.constant 0 : index
    %c0_9 = arith.constant 0 : index
    %16 = vector.load %arg3[%c2, %c0_8, %c0_9] : memref<9x8x4xbf16, #tpu.memory_space<vmem>>, vector<1x8x4xbf16>
    %17 = vector.shape_cast %16 : vector<1x8x4xbf16> to vector<8x4xbf16>
    %18 = vector.extract_strided_slice %4 {offsets = [0, 2], sizes = [4, 256], strides = [1, 1]} : vector<4x384xbf16> to vector<4x256xbf16>
    %cst_10 = arith.constant dense<0.000000e+00> : vector<8x256xf32>
    %19 = tpu.matmul %17, %18, %cst_10 {dimension_numbers = #tpu.dot_dimension_numbers<[1], [0], [0], [1], [0, 0, 1, 1], [], []>} : vector<8x4xbf16>, vector<4x256xbf16>, vector<8x256xf32> -> vector<8x256xf32>
    %20 = arith.addf %15, %19 : vector<8x256xf32>
    %c3 = arith.constant 3 : index
    %c0_11 = arith.constant 0 : index
    %c0_12 = arith.constant 0 : index
    %21 = vector.load %arg3[%c3, %c0_11, %c0_12] : memref<9x8x4xbf16, #tpu.memory_space<vmem>>, vector<1x8x4xbf16>
    %22 = vector.shape_cast %21 : vector<1x8x4xbf16> to vector<8x4xbf16>
    %23 = vector.extract_strided_slice %4 {offsets = [0, 18], sizes = [4, 256], strides = [1, 1]} : vector<4x384xbf16> to vector<4x256xbf16>
    %cst_13 = arith.constant dense<0.000000e+00> : vector<8x256xf32>
    %24 = tpu.matmul %22, %23, %cst_13 {dimension_numbers = #tpu.dot_dimension_numbers<[1], [0], [0], [1], [0, 0, 1, 1], [], []>} : vector<8x4xbf16>, vector<4x256xbf16>, vector<8x256xf32> -> vector<8x256xf32>
    %25 = arith.addf %20, %24 : vector<8x256xf32>
    %c4 = arith.constant 4 : index
    %c0_14 = arith.constant 0 : index
    %c0_15 = arith.constant 0 : index
    %26 = vector.load %arg3[%c4, %c0_14, %c0_15] : memref<9x8x4xbf16, #tpu.memory_space<vmem>>, vector<1x8x4xbf16>
    %27 = vector.shape_cast %26 : vector<1x8x4xbf16> to vector<8x4xbf16>
    %28 = vector.extract_strided_slice %4 {offsets = [0, 19], sizes = [4, 256], strides = [1, 1]} : vector<4x384xbf16> to vector<4x256xbf16>
    %cst_16 = arith.constant dense<0.000000e+00> : vector<8x256xf32>
    %29 = tpu.matmul %27, %28, %cst_16 {dimension_numbers = #tpu.dot_dimension_numbers<[1], [0], [0], [1], [0, 0, 1, 1], [], []>} : vector<8x4xbf16>, vector<4x256xbf16>, vector<8x256xf32> -> vector<8x256xf32>
    %30 = arith.addf %25, %29 : vector<8x256xf32>
    %c5 = arith.constant 5 : index
    %c0_17 = arith.constant 0 : index
    %c0_18 = arith.constant 0 : index
    %31 = vector.load %arg3[%c5, %c0_17, %c0_18] : memref<9x8x4xbf16, #tpu.memory_space<vmem>>, vector<1x8x4xbf16>
    %32 = vector.shape_cast %31 : vector<1x8x4xbf16> to vector<8x4xbf16>
    %33 = vector.extract_strided_slice %4 {offsets = [0, 20], sizes = [4, 256], strides = [1, 1]} : vector<4x384xbf16> to vector<4x256xbf16>
    %cst_19 = arith.constant dense<0.000000e+00> : vector<8x256xf32>
    %34 = tpu.matmul %32, %33, %cst_19 {dimension_numbers = #tpu.dot_dimension_numbers<[1], [0], [0], [1], [0, 0, 1, 1], [], []>} : vector<8x4xbf16>, vector<4x256xbf16>, vector<8x256xf32> -> vector<8x256xf32>
    %35 = arith.addf %30, %34 : vector<8x256xf32>
    %c6 = arith.constant 6 : index
    %c0_20 = arith.constant 0 : index
    %c0_21 = arith.constant 0 : index
    %36 = vector.load %arg3[%c6, %c0_20, %c0_21] : memref<9x8x4xbf16, #tpu.memory_space<vmem>>, vector<1x8x4xbf16>
    %37 = vector.shape_cast %36 : vector<1x8x4xbf16> to vector<8x4xbf16>
    %38 = vector.extract_strided_slice %4 {offsets = [0, 36], sizes = [4, 256], strides = [1, 1]} : vector<4x384xbf16> to vector<4x256xbf16>
    %cst_22 = arith.constant dense<0.000000e+00> : vector<8x256xf32>
    %39 = tpu.matmul %37, %38, %cst_22 {dimension_numbers = #tpu.dot_dimension_numbers<[1], [0], [0], [1], [0, 0, 1, 1], [], []>} : vector<8x4xbf16>, vector<4x256xbf16>, vector<8x256xf32> -> vector<8x256xf32>
    %40 = arith.addf %35, %39 : vector<8x256xf32>
    %c7 = arith.constant 7 : index
    %c0_23 = arith.constant 0 : index
    %c0_24 = arith.constant 0 : index
    %41 = vector.load %arg3[%c7, %c0_23, %c0_24] : memref<9x8x4xbf16, #tpu.memory_space<vmem>>, vector<1x8x4xbf16>
    %42 = vector.shape_cast %41 : vector<1x8x4xbf16> to vector<8x4xbf16>
    %43 = vector.extract_strided_slice %4 {offsets = [0, 37], sizes = [4, 256], strides = [1, 1]} : vector<4x384xbf16> to vector<4x256xbf16>
    %cst_25 = arith.constant dense<0.000000e+00> : vector<8x256xf32>
    %44 = tpu.matmul %42, %43, %cst_25 {dimension_numbers = #tpu.dot_dimension_numbers<[1], [0], [0], [1], [0, 0, 1, 1], [], []>} : vector<8x4xbf16>, vector<4x256xbf16>, vector<8x256xf32> -> vector<8x256xf32>
    %45 = arith.addf %40, %44 : vector<8x256xf32>
    %c8 = arith.constant 8 : index
    %c0_26 = arith.constant 0 : index
    %c0_27 = arith.constant 0 : index
    %46 = vector.load %arg3[%c8, %c0_26, %c0_27] : memref<9x8x4xbf16, #tpu.memory_space<vmem>>, vector<1x8x4xbf16>
    %47 = vector.shape_cast %46 : vector<1x8x4xbf16> to vector<8x4xbf16>
    %48 = vector.extract_strided_slice %4 {offsets = [0, 38], sizes = [4, 256], strides = [1, 1]} : vector<4x384xbf16> to vector<4x256xbf16>
    %cst_28 = arith.constant dense<0.000000e+00> : vector<8x256xf32>
    %49 = tpu.matmul %47, %48, %cst_28 {dimension_numbers = #tpu.dot_dimension_numbers<[1], [0], [0], [1], [0, 0, 1, 1], [], []>} : vector<8x4xbf16>, vector<4x256xbf16>, vector<8x256xf32> -> vector<8x256xf32>
    %50 = arith.addf %45, %49 : vector<8x256xf32>
    %c0_29 = arith.constant 0 : index
    %c0_30 = arith.constant 0 : index
    %51 = vector.load %arg4[%c0_29, %c0_30] : memref<8x1xf32, #tpu.memory_space<vmem>>, vector<8x1xf32>
    %52 = vector.broadcast %51 : vector<8x1xf32> to vector<8x256xf32>
    %53 = arith.addf %50, %52 : vector<8x256xf32>
    %cst_31 = arith.constant 0.000000e+00 : f32
    %54 = vector.broadcast %cst_31 : f32 to vector<8x256xf32>
    %55 = arith.cmpf oge, %53, %54 : vector<8x256xf32>
    %cst_32 = arith.constant 2.000000e-01 : f32
    %56 = vector.broadcast %cst_32 : f32 to vector<8x256xf32>
    %57 = arith.mulf %56, %53 : vector<8x256xf32>
    %58 = arith.select %55, %53, %57 : vector<8x256xi1>, vector<8x256xf32>
    %59 = arith.truncf %58 : vector<8x256xf32> to vector<8x256xbf16>
    %c0_33 = arith.constant 0 : index
    %c0_34 = arith.constant 0 : index
    %c0_35 = arith.constant 0 : index
    %60 = vector.load %arg5[%c0_33, %c0_34, %c0_35] : memref<1x8x256xbf16, #tpu.memory_space<vmem>>, vector<1x8x256xbf16>
    %61 = vector.shape_cast %60 : vector<1x8x256xbf16> to vector<8x256xbf16>
    %62 = vector.shape_cast %59 : vector<8x256xbf16> to vector<1x8x256xbf16>
    tpu.vector_store %arg5[%c0_33, %c0_34, %c0_35], %62 {strides = array<i32>} : memref<1x8x256xbf16, #tpu.memory_space<vmem>>, vector<1x8x256xbf16>,
    return
  }
  func.func @transform_0(%arg0: i32, %arg1: i32) -> (i32, i32, i32) {
    %c0_i32 = arith.constant 0 : i32
    %c0_i32_0 = arith.constant 0 : i32
    %c0_i32_1 = arith.constant 0 : i32
    return %arg0, %c0_i32, %c0_i32_0 : i32, i32, i32
  }
  func.func @transform_1(%arg0: i32, %arg1: i32) -> (i32, i32, i32) {
    %c0_i32 = arith.constant 0 : i32
    %c0_i32_0 = arith.constant 0 : i32
    %c0_i32_1 = arith.constant 0 : i32
    %c0_i32_2 = arith.constant 0 : i32
    return %c0_i32, %c0_i32_0, %c0_i32_1 : i32, i32, i32
  }
  func.func @transform_2(%arg0: i32, %arg1: i32) -> (i32, i32) {
    %c0_i32 = arith.constant 0 : i32
    %c0_i32_0 = arith.constant 0 : i32
    %c0_i32_1 = arith.constant 0 : i32
    return %c0_i32, %c0_i32_0 : i32, i32
  }
  func.func @transform_3(%arg0: i32, %arg1: i32) -> (i32, i32, i32) {
    %c0_i32 = arith.constant 0 : i32
    %c0_i32_0 = arith.constant 0 : i32
    return %arg0, %c0_i32, %arg1 : i32, i32, i32
  }
}

module attributes {stable_mosaic.version = 11 : i64} {
  func.func @_conv_tap_lrelu_kernel(%arg0: i32, %arg1: i32, %arg2: memref<1x8x640xbf16, #tpu.memory_space<vmem>>, %arg3: memref<9x8x8xbf16, #tpu.memory_space<vmem>>, %arg4: memref<8x1xf32, #tpu.memory_space<vmem>>, %arg5: memref<1x8x256xf32, #tpu.memory_space<vmem>>) attributes {dimension_semantics = [#tpu.dimension_semantics<parallel>, #tpu.dimension_semantics<parallel>], iteration_bounds = array<i64: 2, 2>, scalar_prefetch = 0 : i64, scratch_operands = 0 : i64, tpu.core_type = #tpu.core_type<tc>, window_params = [{transform_indices = @transform_0, window_bounds = array<i64: 1, 8, 640>}, {pipeline_mode = #tpu.pipeline_mode<synchronous>, transform_indices = @transform_1, window_bounds = array<i64: 9, 8, 8>}, {pipeline_mode = #tpu.pipeline_mode<synchronous>, transform_indices = @transform_2, window_bounds = array<i64: 8, 1>}, {transform_indices = @transform_3, window_bounds = array<i64: 1, 8, 256>}]} {
    %c256_i32 = arith.constant 256 : i32
    %0 = arith.muli %arg1, %c256_i32 : i32
    %1 = tpu.assume_multiple %0, 128 : i32
    %c0 = arith.constant 0 : index
    %c0_0 = arith.constant 0 : index
    %2 = arith.index_cast %1 : i32 to index
    %3 = vector.load %arg2[%c0, %c0_0, %2] : memref<1x8x640xbf16, #tpu.memory_space<vmem>>, vector<1x8x384xbf16>
    %4 = vector.shape_cast %3 : vector<1x8x384xbf16> to vector<8x384xbf16>
    %cst = arith.constant 0.000000e+00 : f32
    %5 = vector.broadcast %cst : f32 to vector<8x256xf32>
    %c0_1 = arith.constant 0 : index
    %c0_2 = arith.constant 0 : index
    %c0_3 = arith.constant 0 : index
    %6 = vector.load %arg3[%c0_1, %c0_2, %c0_3] : memref<9x8x8xbf16, #tpu.memory_space<vmem>>, vector<1x8x8xbf16>
    %7 = vector.shape_cast %6 : vector<1x8x8xbf16> to vector<8x8xbf16>
    %8 = vector.extract_strided_slice %4 {offsets = [0, 0], sizes = [8, 256], strides = [1, 1]} : vector<8x384xbf16> to vector<8x256xbf16>
    %cst_4 = arith.constant dense<0.000000e+00> : vector<8x256xf32>
    %9 = tpu.matmul %7, %8, %cst_4 {dimension_numbers = #tpu.dot_dimension_numbers<[1], [0], [0], [1], [0, 0, 1, 1], [], []>} : vector<8x8xbf16>, vector<8x256xbf16>, vector<8x256xf32> -> vector<8x256xf32>
    %10 = arith.addf %5, %9 : vector<8x256xf32>
    %c1 = arith.constant 1 : index
    %c0_5 = arith.constant 0 : index
    %c0_6 = arith.constant 0 : index
    %11 = vector.load %arg3[%c1, %c0_5, %c0_6] : memref<9x8x8xbf16, #tpu.memory_space<vmem>>, vector<1x8x8xbf16>
    %12 = vector.shape_cast %11 : vector<1x8x8xbf16> to vector<8x8xbf16>
    %13 = vector.extract_strided_slice %4 {offsets = [0, 1], sizes = [8, 256], strides = [1, 1]} : vector<8x384xbf16> to vector<8x256xbf16>
    %cst_7 = arith.constant dense<0.000000e+00> : vector<8x256xf32>
    %14 = tpu.matmul %12, %13, %cst_7 {dimension_numbers = #tpu.dot_dimension_numbers<[1], [0], [0], [1], [0, 0, 1, 1], [], []>} : vector<8x8xbf16>, vector<8x256xbf16>, vector<8x256xf32> -> vector<8x256xf32>
    %15 = arith.addf %10, %14 : vector<8x256xf32>
    %c2 = arith.constant 2 : index
    %c0_8 = arith.constant 0 : index
    %c0_9 = arith.constant 0 : index
    %16 = vector.load %arg3[%c2, %c0_8, %c0_9] : memref<9x8x8xbf16, #tpu.memory_space<vmem>>, vector<1x8x8xbf16>
    %17 = vector.shape_cast %16 : vector<1x8x8xbf16> to vector<8x8xbf16>
    %18 = vector.extract_strided_slice %4 {offsets = [0, 2], sizes = [8, 256], strides = [1, 1]} : vector<8x384xbf16> to vector<8x256xbf16>
    %cst_10 = arith.constant dense<0.000000e+00> : vector<8x256xf32>
    %19 = tpu.matmul %17, %18, %cst_10 {dimension_numbers = #tpu.dot_dimension_numbers<[1], [0], [0], [1], [0, 0, 1, 1], [], []>} : vector<8x8xbf16>, vector<8x256xbf16>, vector<8x256xf32> -> vector<8x256xf32>
    %20 = arith.addf %15, %19 : vector<8x256xf32>
    %c3 = arith.constant 3 : index
    %c0_11 = arith.constant 0 : index
    %c0_12 = arith.constant 0 : index
    %21 = vector.load %arg3[%c3, %c0_11, %c0_12] : memref<9x8x8xbf16, #tpu.memory_space<vmem>>, vector<1x8x8xbf16>
    %22 = vector.shape_cast %21 : vector<1x8x8xbf16> to vector<8x8xbf16>
    %23 = vector.extract_strided_slice %4 {offsets = [0, 18], sizes = [8, 256], strides = [1, 1]} : vector<8x384xbf16> to vector<8x256xbf16>
    %cst_13 = arith.constant dense<0.000000e+00> : vector<8x256xf32>
    %24 = tpu.matmul %22, %23, %cst_13 {dimension_numbers = #tpu.dot_dimension_numbers<[1], [0], [0], [1], [0, 0, 1, 1], [], []>} : vector<8x8xbf16>, vector<8x256xbf16>, vector<8x256xf32> -> vector<8x256xf32>
    %25 = arith.addf %20, %24 : vector<8x256xf32>
    %c4 = arith.constant 4 : index
    %c0_14 = arith.constant 0 : index
    %c0_15 = arith.constant 0 : index
    %26 = vector.load %arg3[%c4, %c0_14, %c0_15] : memref<9x8x8xbf16, #tpu.memory_space<vmem>>, vector<1x8x8xbf16>
    %27 = vector.shape_cast %26 : vector<1x8x8xbf16> to vector<8x8xbf16>
    %28 = vector.extract_strided_slice %4 {offsets = [0, 19], sizes = [8, 256], strides = [1, 1]} : vector<8x384xbf16> to vector<8x256xbf16>
    %cst_16 = arith.constant dense<0.000000e+00> : vector<8x256xf32>
    %29 = tpu.matmul %27, %28, %cst_16 {dimension_numbers = #tpu.dot_dimension_numbers<[1], [0], [0], [1], [0, 0, 1, 1], [], []>} : vector<8x8xbf16>, vector<8x256xbf16>, vector<8x256xf32> -> vector<8x256xf32>
    %30 = arith.addf %25, %29 : vector<8x256xf32>
    %c5 = arith.constant 5 : index
    %c0_17 = arith.constant 0 : index
    %c0_18 = arith.constant 0 : index
    %31 = vector.load %arg3[%c5, %c0_17, %c0_18] : memref<9x8x8xbf16, #tpu.memory_space<vmem>>, vector<1x8x8xbf16>
    %32 = vector.shape_cast %31 : vector<1x8x8xbf16> to vector<8x8xbf16>
    %33 = vector.extract_strided_slice %4 {offsets = [0, 20], sizes = [8, 256], strides = [1, 1]} : vector<8x384xbf16> to vector<8x256xbf16>
    %cst_19 = arith.constant dense<0.000000e+00> : vector<8x256xf32>
    %34 = tpu.matmul %32, %33, %cst_19 {dimension_numbers = #tpu.dot_dimension_numbers<[1], [0], [0], [1], [0, 0, 1, 1], [], []>} : vector<8x8xbf16>, vector<8x256xbf16>, vector<8x256xf32> -> vector<8x256xf32>
    %35 = arith.addf %30, %34 : vector<8x256xf32>
    %c6 = arith.constant 6 : index
    %c0_20 = arith.constant 0 : index
    %c0_21 = arith.constant 0 : index
    %36 = vector.load %arg3[%c6, %c0_20, %c0_21] : memref<9x8x8xbf16, #tpu.memory_space<vmem>>, vector<1x8x8xbf16>
    %37 = vector.shape_cast %36 : vector<1x8x8xbf16> to vector<8x8xbf16>
    %38 = vector.extract_strided_slice %4 {offsets = [0, 36], sizes = [8, 256], strides = [1, 1]} : vector<8x384xbf16> to vector<8x256xbf16>
    %cst_22 = arith.constant dense<0.000000e+00> : vector<8x256xf32>
    %39 = tpu.matmul %37, %38, %cst_22 {dimension_numbers = #tpu.dot_dimension_numbers<[1], [0], [0], [1], [0, 0, 1, 1], [], []>} : vector<8x8xbf16>, vector<8x256xbf16>, vector<8x256xf32> -> vector<8x256xf32>
    %40 = arith.addf %35, %39 : vector<8x256xf32>
    %c7 = arith.constant 7 : index
    %c0_23 = arith.constant 0 : index
    %c0_24 = arith.constant 0 : index
    %41 = vector.load %arg3[%c7, %c0_23, %c0_24] : memref<9x8x8xbf16, #tpu.memory_space<vmem>>, vector<1x8x8xbf16>
    %42 = vector.shape_cast %41 : vector<1x8x8xbf16> to vector<8x8xbf16>
    %43 = vector.extract_strided_slice %4 {offsets = [0, 37], sizes = [8, 256], strides = [1, 1]} : vector<8x384xbf16> to vector<8x256xbf16>
    %cst_25 = arith.constant dense<0.000000e+00> : vector<8x256xf32>
    %44 = tpu.matmul %42, %43, %cst_25 {dimension_numbers = #tpu.dot_dimension_numbers<[1], [0], [0], [1], [0, 0, 1, 1], [], []>} : vector<8x8xbf16>, vector<8x256xbf16>, vector<8x256xf32> -> vector<8x256xf32>
    %45 = arith.addf %40, %44 : vector<8x256xf32>
    %c8 = arith.constant 8 : index
    %c0_26 = arith.constant 0 : index
    %c0_27 = arith.constant 0 : index
    %46 = vector.load %arg3[%c8, %c0_26, %c0_27] : memref<9x8x8xbf16, #tpu.memory_space<vmem>>, vector<1x8x8xbf16>
    %47 = vector.shape_cast %46 : vector<1x8x8xbf16> to vector<8x8xbf16>
    %48 = vector.extract_strided_slice %4 {offsets = [0, 38], sizes = [8, 256], strides = [1, 1]} : vector<8x384xbf16> to vector<8x256xbf16>
    %cst_28 = arith.constant dense<0.000000e+00> : vector<8x256xf32>
    %49 = tpu.matmul %47, %48, %cst_28 {dimension_numbers = #tpu.dot_dimension_numbers<[1], [0], [0], [1], [0, 0, 1, 1], [], []>} : vector<8x8xbf16>, vector<8x256xbf16>, vector<8x256xf32> -> vector<8x256xf32>
    %50 = arith.addf %45, %49 : vector<8x256xf32>
    %c0_29 = arith.constant 0 : index
    %c0_30 = arith.constant 0 : index
    %51 = vector.load %arg4[%c0_29, %c0_30] : memref<8x1xf32, #tpu.memory_space<vmem>>, vector<8x1xf32>
    %52 = vector.broadcast %51 : vector<8x1xf32> to vector<8x256xf32>
    %53 = arith.addf %50, %52 : vector<8x256xf32>
    %cst_31 = arith.constant 0.000000e+00 : f32
    %54 = vector.broadcast %cst_31 : f32 to vector<8x256xf32>
    %55 = arith.cmpf oge, %53, %54 : vector<8x256xf32>
    %cst_32 = arith.constant 2.000000e-01 : f32
    %56 = vector.broadcast %cst_32 : f32 to vector<8x256xf32>
    %57 = arith.mulf %56, %53 : vector<8x256xf32>
    %58 = arith.select %55, %53, %57 : vector<8x256xi1>, vector<8x256xf32>
    %c0_33 = arith.constant 0 : index
    %c0_34 = arith.constant 0 : index
    %c0_35 = arith.constant 0 : index
    %59 = vector.load %arg5[%c0_33, %c0_34, %c0_35] : memref<1x8x256xf32, #tpu.memory_space<vmem>>, vector<1x8x256xf32>
    %60 = vector.shape_cast %59 : vector<1x8x256xf32> to vector<8x256xf32>
    %61 = vector.shape_cast %58 : vector<8x256xf32> to vector<1x8x256xf32>
    tpu.vector_store %arg5[%c0_33, %c0_34, %c0_35], %61 {strides = array<i32>} : memref<1x8x256xf32, #tpu.memory_space<vmem>>, vector<1x8x256xf32>,
    return
  }
  func.func @transform_0(%arg0: i32, %arg1: i32) -> (i32, i32, i32) {
    %c0_i32 = arith.constant 0 : i32
    %c0_i32_0 = arith.constant 0 : i32
    %c0_i32_1 = arith.constant 0 : i32
    return %arg0, %c0_i32, %c0_i32_0 : i32, i32, i32
  }
  func.func @transform_1(%arg0: i32, %arg1: i32) -> (i32, i32, i32) {
    %c0_i32 = arith.constant 0 : i32
    %c0_i32_0 = arith.constant 0 : i32
    %c0_i32_1 = arith.constant 0 : i32
    %c0_i32_2 = arith.constant 0 : i32
    return %c0_i32, %c0_i32_0, %c0_i32_1 : i32, i32, i32
  }
  func.func @transform_2(%arg0: i32, %arg1: i32) -> (i32, i32) {
    %c0_i32 = arith.constant 0 : i32
    %c0_i32_0 = arith.constant 0 : i32
    %c0_i32_1 = arith.constant 0 : i32
    return %c0_i32, %c0_i32_0 : i32, i32
  }
  func.func @transform_3(%arg0: i32, %arg1: i32) -> (i32, i32, i32) {
    %c0_i32 = arith.constant 0 : i32
    %c0_i32_0 = arith.constant 0 : i32
    return %arg0, %c0_i32, %arg1 : i32, i32, i32
  }
}

</mosaic_0001>

<bundles_post_ra>
// kernel: conv_block_forward.2
= control target key start
LH: loop header
LB: loop body
LE: loop exit
PB: predicated region body
PF: predicated region fallthrough
CT: control target
= control target key end

     0   :  { %s1046_s12 = smov 0   ;;  %s1048_s13 = smov 0   ;;  %s1172_s0 = inlined_call_operand.vmem [shape: bf16[2,4,640], index: 0, kind: input, shape index: {}]   ;;  %s1173_s1 = inlined_call_operand.vmem [shape: bf16[9,8,4], index: 1, kind: input, shape index: {}]   ;;  %s1174_s2 = inlined_call_operand.vmem [shape: f32[8,1], index: 2, kind: input, shape index: {}]   ;;  %s1175_s3 = inlined_call_operand.vmem [shape: bf16[2,8,512], index: 3, kind: output, shape index: {}]  }
   0x1   :  { %s1050_s14 = smov 0   ;;  %s1052_s15 = smov 0  }
   0x2   :  { %s1054_s16 = smov 0  }
   0x3 LB: > { %s22_s17 = sadd.s32 1, %s1006_s14  ;;  %s25_s18 = sadd.s32 1, %s1010_s15  ;;  %s1014_s16 = sphi %s1054_s16, %s13_s16   ;;  %s1010_s15 = sphi %s1052_s15, %s1179_s15   ;;  %s1006_s14 = sphi %s1050_s14, %s1178_s14   ;;  %s1002_s13 = sphi %s1048_s13, %s1177_s13   ;;  %s998_s12 = sphi %s1046_s12, %s1176_s12  }
   0x4   : > { %p23_p0 = scmp.ge.s32.totalorder %s22_s17, 2  ;;  %p886_p1 = scmp.ge.s32.totalorder %s1014_s16, 1 }
   0x5   : > { %p151_p2 = scmp.lt.s32.totalorder %s1014_s16, 5 }
   0x6   : > { %s1181_s17 = smov (%p23_p0, %s22_s17), 0  ;;  %s1183_s18 = smov (!%p23_p0, %s25_s18), %s1010_s15 }
   0x7   : > { %p152_p3 = pnand %p886_p1, %p151_p2  ;;  %p27_p4 = scmp.ge.s32.totalorder %s1183_s18, 2 }
   0x8   : > { %p179_p5 = scmp.lt.s32.totalorder (!%p152_p3), %s1002_s13, 1  ;;  %s891_s19 = sshll.u32 (!%p152_p3), %s998_s12, 8 }
   0x9   : > { %s1185_s18 = smov (%p27_p4, %s1183_s18), 0  ;;  %155 = sbr.rel (%p152_p3) target bundleno = 392 (0x188), region = 32 }
   0xa   : > { %s196_s20 = sshra.s32 (!%p152_p3), %s891_s19, 7  ;;  %s1018_s27 = smov (!%p152_p3), 126  }
   0xb   : > { %s892_s22 = sshll.u32 (!%p152_p3), %s196_s20, 1  ;;  %s1019_s28 = smov (!%p152_p3), 127  }
   0xc   : > { %s1020_s4 = smov (!%p152_p3), 110   ;;  %s1021_s5 = smov (!%p152_p3), 109  }
   0xd   : > { %s1022_s6 = smov (!%p152_p3), 108   ;;  %s1023_s7 = smov (!%p152_p3), 92  }
   0xe   : > { %v209_v0 = vlaneseq  ;;  %v1016_v1 = vmov 1983009808   ;;  %s1187_s13 = smov (!%p179_p5, %s1002_s13), 1  ;;  %vm234_vm0 = vcmask 1041408   ;;  %v1017_v9 = vmov 0   ;;  %s1024_s8 = smov 91  }
   0xf   : > { %v207_v2 = vunpack.c.l.s4 %v1016_v1  ;;  %s923_s21 = smul.u32 10, %s1187_s13  ;;  %273 = vmatprep.mubr.bf16.mxu0 %v1017_v9  ;;  %323 = vmatprep.mubr.bf16.mxu1 %v1017_v9  ;;  %v201_v13 = vld [vmem:[%s1173_s1] sm:$0xf]  ;;  %vm230_vm1 = vcmask 31744   ;;  %s1025_s9 = smov 90   ;;  %vm227_vm2 = vcmask 1039360  }
  0x10   : > { %v210_v3 = vshrl.u32 %v209_v0, 7  ;;  %974 = vset.pattern.permute.xlu0 %v1017_v9  ;;  %v773_v14 = vld [vmem:[%s1174_s2] sm:$0xff]  ;;  %vm340_vm3 = vcmask 1031168   ;;  %vm403_vm4 = vcmask 900096   ;;  %vm466_vm5 = vcmask 891904  }
  0x11   : > { %v208_v4 = vunpack.c.0.s8 %v207_v2  ;;  %s183_s25 = scalar_lea.vmem %s1172_s0, %s923_s21  ;;  %v893_v24 = vld [vmem:[%s1173_s1 + $0x4] sm:$0xf]  ;;  %v898_v35 = vld [vmem:[%s1173_s1 + $0x8] sm:$0xf]  ;;  %v901_v38 = vld [vmem:[%s1173_s1 + $0xc] sm:$0xf] }
  0x12   : > { %s199_s26 = scalar_lea.vmem %s183_s25, %s892_s22  ;;  %vm529_vm6 = vcmask 883712   ;;  %v904_v45 = vld [vmem:[%s1173_s1 + $0x10] sm:$0xf]  ;;  %vm592_vm7 = vcmask 752640   ;;  %v907_v50 = vld [vmem:[%s1173_s1 + $0x14] sm:$0xf] }
  0x13   : > { %v211_v5 = vsub.s32 %v208_v4, %v210_v3  ;;  %v200_v6 = vld [vmem:[%s199_s26] sm:$0x3f]  ;;  %v910_v56 = vld [vmem:[%s1173_s1 + $0x18] sm:$0xf]  ;;  %vm655_vm8 = vcmask 744448   ;;  %vm718_vm9 = vcmask 736256  }
  0x14   : > { %v205_v8 = vcombine.high %v200_v6, %v200_v6  ;;  %v913_v0 = vld [vmem:[%s1173_s1 + $0x1c] sm:$0xf] }
  0x15   : > { %v212_v7 = vrot.slane %v200_v6, %v211_v5  ;;  %v916_v6 = vld [vmem:[%s1173_s1 + $0x20] sm:$0xf] }
  0x16   : > { %v219_v10 = vrot.slane %v205_v8, %v211_v5 }
  0x17   : > { %334 = vrot.lane.b32.xlu1 %v212_v7, %s1018_s27  ;;  %221 = vrot.lane.b32.xlu0 %v212_v7, %s1019_s28  ;;  %v220_v11 = vcombine.high %v212_v7, %v212_v7  ;;  %v286_v12 = vsel %vm234_vm0, %v212_v7, 0 }
  0x19   : > { %896 = vmatprep.subr.msk.bf16.mxu1 %vm234_vm0, %v220_v11 }
  0x1a   : > { %306 = vmatpush1.bf16.msra.mxu1 %v286_v12 }
  0x1b   : > { %397 = vrot.lane.b32.xlu0 %v212_v7, %s1020_s4  ;;  %225 = vrot.lane.b32.xlu1 %v219_v10, %s1019_s28 }
  0x1d   : > { %897 = vmatmul.mubr.msk.bf16.vlgmr.msra.gmra.mxu1 %vm230_vm1, %v201_v13 }
  0x1e   : > { %447 = vmatprep.mubr.bf16.mxu1 %v1017_v9 }
  0x1f   : > { %223 = vrot.lane.b32.xlu0 %v220_v11, %s1019_s28  ;;  %338 = vrot.lane.b32.xlu1 %v219_v10, %s1018_s27 }
  0x23   : > { %336 = vrot.lane.b32.xlu0 %v220_v11, %s1018_s27  ;;  %399 = vrot.lane.b32.xlu1 %v220_v11, %s1020_s4 }
  0x27   : > { %401 = vrot.lane.b32.xlu0 %v219_v10, %s1020_s4  ;;  %460 = vrot.lane.b32.xlu1 %v212_v7, %s1021_s5 }
  0x2b   : > { %462 = vrot.lane.b32.xlu0 %v220_v11, %s1021_s5  ;;  %464 = vrot.lane.b32.xlu1 %v219_v10, %s1021_s5 }
  0x2f   : > { %523 = vrot.lane.b32.xlu0 %v212_v7, %s1022_s6  ;;  %525 = vrot.lane.b32.xlu1 %v220_v11, %s1022_s6 }
  0x33   : > { %527 = vrot.lane.b32.xlu0 %v219_v10, %s1022_s6  ;;  %586 = vrot.lane.b32.xlu1 %v212_v7, %s1023_s7 }
  0x37   : > { %588 = vrot.lane.b32.xlu0 %v220_v11, %s1023_s7  ;;  %590 = vrot.lane.b32.xlu1 %v219_v10, %s1023_s7 }
  0x3b   : > { %649 = vrot.lane.b32.xlu0 %v212_v7, %s1024_s8  ;;  %651 = vrot.lane.b32.xlu1 %v220_v11, %s1024_s8 }
  0x3f   : > { %653 = vrot.lane.b32.xlu0 %v219_v10, %s1024_s8  ;;  %712 = vrot.lane.b32.xlu1 %v212_v7, %s1025_s9  ;;  %s888_s8 = sshll.u32 %s998_s12, 1 }
  0x40   : > { %p187_p6 = scmp.lt.s32.totalorder %s888_s8, 3 }
  0x42   : > { %s1189_s8 = smov (!%p187_p6, %s888_s8), 3 }
  0x43   : > { %714 = vrot.lane.b32.xlu0 %v220_v11, %s1025_s9  ;;  %716 = vrot.lane.b32.xlu1 %v219_v10, %s1025_s9  ;;  %s889_s9 = sshll.u32 %s1187_s13, 2 }
  0x44   : > { %s190_s12 = sadd.s32 %s889_s9, %s1189_s8 }
  0x45   : > { %s890_s10 = sshll.u32 %s190_s12, 2 }
  0x46   : > { %s192_s13 = scalar_lea.vmem %s1175_s3, %s890_s10 }
  0x47   : > { %776 = vperm.xlu0 %974, %v773_v14  }
  0x89   : > { %v335_v15 = vpop.permute.xlu1 %334  ;;  %v222_v16 = vpop.permute.xlu0 %221 }
  0x8d   : > { %v398_v17 = vpop.permute.xlu0 %397  ;;  %v226_v18 = vpop.permute.xlu1 %225 }
  0x91   : > { %v224_v19 = vpop.permute.xlu0 %223  ;;  %v339_v20 = vpop.permute.xlu1 %338 }
  0x92   : > { %v229_v21 = vsel %vm227_vm2, %v224_v19, %v226_v18  ;;  %v228_v22 = vsel %vm227_vm2, %v222_v16, %v224_v19 }
  0x93   : > { %894 = vmatprep.subr.msk.bf16.mxu0 %vm234_vm0, %v229_v21  ;;  %v236_v23 = vsel %vm234_vm0, %v228_v22, 0 }
  0x94   : > { %256 = vmatpush1.bf16.msra.mxu0 %v236_v23 }
  0x95   : > { %v337_v25 = vpop.permute.xlu0 %336  ;;  %v400_v26 = vpop.permute.xlu1 %399 }
  0x96   : > { %v341_v27 = vsel %vm340_vm3, %v335_v15, %v337_v25  ;;  %v342_v28 = vsel %vm340_vm3, %v337_v25, %v339_v20  ;;  %v404_v30 = vsel %vm403_vm4, %v398_v17, %v400_v26 }
  0x97   : > { %v347_v29 = vsel %vm234_vm0, %v341_v27, 0  ;;  %895 = vmatmul.mubr.msk.bf16.vlgmr.msra.gmra.mxu0 %vm230_vm1, %v893_v24  ;;  %899 = vmatprep.subr.msk.bf16.mxu0 %vm234_vm0, %v342_v28  ;;  %v410_v34 = vsel %vm234_vm0, %v404_v30, 0 }
  0x98   : > { %367 = vmatpush1.bf16.msra.mxu0 %v347_v29  ;;  %384 = vmatprep.mubr.bf16.mxu0 %v1017_v9 }
  0x99   : > { %v402_v31 = vpop.permute.xlu0 %401  ;;  %v461_v32 = vpop.permute.xlu1 %460 }
  0x9a   : > { %v405_v33 = vsel %vm403_vm4, %v400_v26, %v402_v31 }
  0x9b   : > { %902 = vmatprep.subr.msk.bf16.mxu1 %vm234_vm0, %v405_v33 }
  0x9c   : > { %430 = vmatpush1.bf16.msra.mxu1 %v410_v34 }
  0x9d   : > { %v463_v36 = vpop.permute.xlu0 %462  ;;  %v465_v37 = vpop.permute.xlu1 %464 }
  0x9e   : > { %v467_v39 = vsel %vm466_vm5, %v461_v32, %v463_v36  ;;  %v468_v40 = vsel %vm466_vm5, %v463_v36, %v465_v37 }
  0x9f   : > { %v473_v41 = vsel %vm234_vm0, %v467_v39, 0  ;;  %900 = vmatmul.mubr.msk.bf16.vlgmr.msra.gmra.mxu0 %vm230_vm1, %v898_v35  ;;  %905 = vmatprep.subr.msk.bf16.mxu0 %vm234_vm0, %v468_v40 }
  0xa0   : > { %493 = vmatpush1.bf16.msra.mxu0 %v473_v41  ;;  %903 = vmatmul.mubr.msk.bf16.vlgmr.msra.gmra.mxu1 %vm230_vm1, %v901_v38 }
  0xa1   : > { %v524_v42 = vpop.permute.xlu0 %523  ;;  %v526_v43 = vpop.permute.xlu1 %525  ;;  %510 = vmatprep.mubr.bf16.mxu0 %v1017_v9  ;;  %573 = vmatprep.mubr.bf16.mxu1 %v1017_v9 }
  0xa2   : > { %v530_v44 = vsel %vm529_vm6, %v524_v42, %v526_v43 }
  0xa3   : > { %v536_v49 = vsel %vm234_vm0, %v530_v44, 0 }
  0xa5   : > { %v528_v46 = vpop.permute.xlu0 %527  ;;  %v587_v47 = vpop.permute.xlu1 %586 }
  0xa6   : > { %v531_v48 = vsel %vm529_vm6, %v526_v43, %v528_v46 }
  0xa7   : > { %906 = vmatmul.mubr.msk.bf16.vlgmr.msra.gmra.mxu0 %vm230_vm1, %v904_v45  ;;  %908 = vmatprep.subr.msk.bf16.mxu1 %vm234_vm0, %v531_v48 }
  0xa8   : > { %556 = vmatpush1.bf16.msra.mxu1 %v536_v49  ;;  %636 = vmatprep.mubr.bf16.mxu0 %v1017_v9 }
  0xa9   : > { %v589_v51 = vpop.permute.xlu0 %588  ;;  %v591_v52 = vpop.permute.xlu1 %590 }
  0xaa   : > { %v593_v53 = vsel %vm592_vm7, %v587_v47, %v589_v51  ;;  %v594_v54 = vsel %vm592_vm7, %v589_v51, %v591_v52 }
  0xab   : > { %v599_v55 = vsel %vm234_vm0, %v593_v53, 0  ;;  %909 = vmatmul.mubr.msk.bf16.vlgmr.msra.gmra.mxu1 %vm230_vm1, %v907_v50  ;;  %911 = vmatprep.subr.msk.bf16.mxu0 %vm234_vm0, %v594_v54 }
  0xac   : > { %619 = vmatpush1.bf16.msra.mxu0 %v599_v55  ;;  %699 = vmatprep.mubr.bf16.mxu1 %v1017_v9 }
  0xad   : > { %v650_v57 = vpop.permute.xlu0 %649  ;;  %v652_v58 = vpop.permute.xlu1 %651 }
  0xae   : > { %v656_v59 = vsel %vm655_vm8, %v650_v57, %v652_v58 }
  0xaf   : > { %912 = vmatmul.mubr.msk.bf16.vlgmr.msra.gmra.mxu0 %vm230_vm1, %v910_v56  ;;  %v662_v63 = vsel %vm234_vm0, %v656_v59, 0 }
  0xb0   : > { %762 = vmatprep.mubr.bf16.mxu0 %v1017_v9 }
  0xb1   : > { %v654_v60 = vpop.permute.xlu0 %653  ;;  %v713_v61 = vpop.permute.xlu1 %712 }
  0xb2   : > { %v657_v62 = vsel %vm655_vm8, %v652_v58, %v654_v60 }
  0xb3   : > { %914 = vmatprep.subr.msk.bf16.mxu1 %vm234_vm0, %v657_v62 }
  0xb4   : > { %682 = vmatpush1.bf16.msra.mxu1 %v662_v63 }
  0xb5   : > { %v715_v1 = vpop.permute.xlu0 %714  ;;  %v717_v2 = vpop.permute.xlu1 %716 }
  0xb6   : > { %v719_v3 = vsel %vm718_vm9, %v713_v61, %v715_v1  ;;  %v720_v4 = vsel %vm718_vm9, %v715_v1, %v717_v2 }
  0xb7   : > { %v725_v5 = vsel %vm234_vm0, %v719_v3, 0  ;;  %915 = vmatmul.mubr.msk.bf16.vlgmr.msra.gmra.mxu1 %vm230_vm1, %v913_v0  ;;  %917 = vmatprep.subr.msk.bf16.mxu0 %vm234_vm0, %v720_v4 }
  0xb8   : > { %745 = vmatpush1.bf16.msra.mxu0 %v725_v5 }
  0xbb   : > { %918 = vmatmul.mubr.msk.bf16.vlgmr.msra.gmra.mxu0 %vm230_vm1, %v916_v6 }
  0xc2   : > { %v777_v50 = vpop.permute.xlu0 %776 }
  0xdd   : > { %v325_v7 = vpop.f32.mrf.mxu1 }
  0xdf   : > { %v327_v8 = vpop.f32.mrf.mxu1 }
  0xe1   : > { %v329_v9 = vpop.f32.mrf.mxu1 }
  0xe3   : > { %v330_v10 = vpop.f32.mrf.mxu1 }
 0x157   : > { %v275_v11 = vpop.f32.mrf.mxu0 }
 0x158   : > { %v326_v27 = vadd.f32 %v325_v7, %v275_v11 }
 0x159   : > { %v277_v12 = vpop.f32.mrf.mxu0 }
 0x15a   : > { %v328_v30 = vadd.f32 %v327_v8, %v277_v12 }
 0x15b   : > { %v279_v13 = vpop.f32.mrf.mxu0 }
 0x15d   : > { %v280_v14 = vpop.f32.mrf.mxu0 }
 0x15f   : > { %v386_v15 = vpop.f32.mrf.mxu0 }
 0x160   : > { %v449_v16 = vpop.f32.mrf.mxu1  ;;  %v393_v31 = vadd.f32 %v386_v15, %v326_v27 }
 0x161   : > { %v388_v17 = vpop.f32.mrf.mxu0 }
 0x162   : > { %v451_v18 = vpop.f32.mrf.mxu1  ;;  %v394_v34 = vadd.f32 %v388_v17, %v328_v30  ;;  %v456_v37 = vadd.f32 %v449_v16, %v393_v31 }
 0x163   : > { %v390_v19 = vpop.f32.mrf.mxu0 }
 0x164   : > { %v453_v20 = vpop.f32.mrf.mxu1  ;;  %v457_v39 = vadd.f32 %v451_v18, %v394_v34 }
 0x165   : > { %v391_v21 = vpop.f32.mrf.mxu0 }
 0x166   : > { %v454_v22 = vpop.f32.mrf.mxu1 }
 0x167   : > { %v512_v23 = vpop.f32.mrf.mxu0 }
 0x168   : > { %v519_v40 = vadd.f32 %v512_v23, %v456_v37 }
 0x169   : > { %v514_v24 = vpop.f32.mrf.mxu0 }
 0x16a   : > { %v520_v42 = vadd.f32 %v514_v24, %v457_v39 }
 0x16b   : > { %v516_v25 = vpop.f32.mrf.mxu0  ;;  %v575_v26 = vpop.f32.mrf.mxu1 }
 0x16c   : > { %v582_v43 = vadd.f32 %v575_v26, %v519_v40 }
 0x16d   : > { %v517_v28 = vpop.f32.mrf.mxu0  ;;  %v577_v29 = vpop.f32.mrf.mxu1 }
 0x16e   : > { %v583_v45 = vadd.f32 %v577_v29, %v520_v42 }
 0x16f   : > { %v638_v32 = vpop.f32.mrf.mxu0  ;;  %v579_v33 = vpop.f32.mrf.mxu1 }
 0x170   : > { %v645_v46 = vadd.f32 %v638_v32, %v582_v43 }
 0x171   : > { %v640_v35 = vpop.f32.mrf.mxu0  ;;  %v580_v36 = vpop.f32.mrf.mxu1 }
 0x172   : > { %v646_v48 = vadd.f32 %v640_v35, %v583_v45 }
 0x173   : > { %v642_v38 = vpop.f32.mrf.mxu0 }
 0x175   : > { %v643_v41 = vpop.f32.mrf.mxu0 }
 0x177   : > { %v701_v44 = vpop.f32.mrf.mxu1 }
 0x178   : > { %v708_v49 = vadd.f32 %v701_v44, %v645_v46 }
 0x179   : > { %v703_v47 = vpop.f32.mrf.mxu1 }
 0x17a   : > { %v709_v53 = vadd.f32 %v703_v47, %v646_v48 }
 0x17b   : > { %v764_v51 = vpop.f32.mrf.mxu0  ;;  %v705_v52 = vpop.f32.mrf.mxu1 }
 0x17c   : > { %v771_v54 = vadd.f32 %v764_v51, %v708_v49 }
 0x17d   : > { %v766_v55 = vpop.f32.mrf.mxu0  ;;  %v706_v56 = vpop.f32.mrf.mxu1 }
 0x17e   : > { %v779_v57 = vadd.f32 %v777_v50, %v771_v54  ;;  %v772_v58 = vadd.f32 %v766_v55, %v709_v53 }
 0x17f   : > { %v768_v59 = vpop.f32.mrf.mxu0 }
 0x180   : > { %v783_v60 = vmul.f32 0.2, %v779_v57  ;;  %v780_v61 = vadd.f32 %v777_v50, %v772_v58  ;;  %vm781_vm10 = vcmp.ge.f32.partialorder %v779_v57, 0.0 }
 0x181   : > { %v769_v62 = vpop.f32.mrf.mxu0 }
 0x182   : > { %vm782_vm11 = vcmp.ge.f32.partialorder %v780_v61, 0.0  ;;  %v784_v63 = vmul.f32 0.2, %v780_v61  ;;  %v785_v0 = vsel %vm781_vm10, %v779_v57, %v783_v60 }
 0x184   : > { %v786_v1 = vsel %vm782_vm11, %v780_v61, %v784_v63 }
 0x185   : > { %v922_v2 = vpack.c.bf16 %v786_v1, %v785_v0 }
 0x187   : > { %795 = vst [vmem:[%s192_s13] sm:$0xff] %v922_v2 }
 0x188 PF: > { %s13_s16 = sadd.s32 1, %s1014_s16   ;;  %s1176_s12 = smov %s1006_s14 }
 0x189   : > { %p10_p7 = scmp.ge.s32.totalorder %s13_s16, 6   ;;  %s1177_s13 = smov %s1010_s15 }
 0x18a   : > { %s1178_s14 = smov %s1181_s17  ;;  %s1179_s15 = smov %s1185_s18 }
 0x18b   :  { %12 = sbr.rel (!%p10_p7) target bundleno = 3 (0x3), region = 71 }

// kernel: conv_block_forward.3
= control target key start
LH: loop header
LB: loop body
LE: loop exit
PB: predicated region body
PF: predicated region fallthrough
CT: control target
= control target key end

     0   :  { %s1032_s12 = smov 0   ;;  %s1034_s13 = smov 0   ;;  %s1158_s0 = inlined_call_operand.vmem [shape: bf16[2,8,640], index: 0, kind: input, shape index: {}]   ;;  %s1159_s1 = inlined_call_operand.vmem [shape: bf16[9,8,8], index: 1, kind: input, shape index: {}]   ;;  %s1160_s2 = inlined_call_operand.vmem [shape: f32[8,1], index: 2, kind: input, shape index: {}]   ;;  %s1161_s3 = inlined_call_operand.vmem [shape: f32[2,8,512], index: 3, kind: output, shape index: {}]  }
   0x1   :  { %s1036_s14 = smov 0   ;;  %s1038_s15 = smov 0  }
   0x2   :  { %s1040_s16 = smov 0  }
   0x3 LB: > { %s22_s17 = sadd.s32 1, %s993_s14  ;;  %s25_s18 = sadd.s32 1, %s997_s15  ;;  %s1001_s16 = sphi %s1040_s16, %s13_s16   ;;  %s997_s15 = sphi %s1038_s15, %s1165_s15   ;;  %s993_s14 = sphi %s1036_s14, %s1164_s14   ;;  %s989_s13 = sphi %s1034_s13, %s1163_s13   ;;  %s985_s12 = sphi %s1032_s12, %s1162_s12  }
   0x4   : > { %p23_p0 = scmp.ge.s32.totalorder %s22_s17, 2  ;;  %p871_p1 = scmp.ge.s32.totalorder %s1001_s16, 1 }
   0x5   : > { %p151_p2 = scmp.lt.s32.totalorder %s1001_s16, 5 }
   0x6   : > { %s1167_s17 = smov (%p23_p0, %s22_s17), 0  ;;  %s1169_s18 = smov (!%p23_p0, %s25_s18), %s997_s15 }
   0x7   : > { %p152_p3 = pnand %p871_p1, %p151_p2  ;;  %p27_p4 = scmp.ge.s32.totalorder %s1169_s18, 2 }
   0x8   : > { %p179_p5 = scmp.lt.s32.totalorder (!%p152_p3), %s989_s13, 1  ;;  %s876_s19 = sshll.u32 (!%p152_p3), %s985_s12, 8 }
   0x9   : > { %s1171_s18 = smov (%p27_p4, %s1169_s18), 0  ;;  %155 = sbr.rel (%p152_p3) target bundleno = 389 (0x185), region = 32 }
   0xa   : > { %s196_s20 = sshra.s32 (!%p152_p3), %s876_s19, 7  ;;  %s1004_s27 = smov (!%p152_p3), 127  }
   0xb   : > { %s877_s22 = sshll.u32 (!%p152_p3), %s196_s20, 2  ;;  %s1005_s30 = smov (!%p152_p3), 126  }
   0xc   : > { %s1006_s4 = smov (!%p152_p3), 110   ;;  %s1007_s5 = smov (!%p152_p3), 109  }
   0xd   : > { %s1008_s6 = smov (!%p152_p3), 108   ;;  %s1009_s7 = smov (!%p152_p3), 92  }
   0xe   : > { %s1173_s13 = smov (!%p179_p5, %s989_s13), 1  ;;  %v1003_v0 = vmov 0   ;;  %vm226_vm0 = vcmask 1043456   ;;  %v202_v6 = vld [vmem:[%s1159_s1] sm:$0xf]  ;;  %vm222_vm1 = vcmask 64512  }
   0xf   : > { %s909_s21 = smul.u32 20, %s1173_s13  ;;  %265 = vmatprep.mubr.bf16.mxu0 %v1003_v0  ;;  %315 = vmatprep.mubr.bf16.mxu1 %v1003_v0  ;;  %s1010_s8 = smov 91   ;;  %v765_v7 = vld [vmem:[%s1160_s2] sm:$0xff]  ;;  %vm219_vm2 = vcmask 1039360   ;;  %vm332_vm3 = vcmask 1031168   ;;  %vm395_vm4 = vcmask 900096  }
  0x10   : > { %959 = vset.pattern.permute.xlu0 %v1003_v0  ;;  %s1011_s9 = smov 90   ;;  %v878_v16 = vld [vmem:[%s1159_s1 + $0x4] sm:$0xf]  ;;  %v886_v25 = vld [vmem:[%s1159_s1 + $0x8] sm:$0xf]  ;;  %vm458_vm5 = vcmask 891904  }
  0x11   : > { %s183_s25 = scalar_lea.vmem %s1158_s0, %s909_s21  ;;  %v889_v30 = vld [vmem:[%s1159_s1 + $0xc] sm:$0xf]  ;;  %v892_v36 = vld [vmem:[%s1159_s1 + $0x10] sm:$0xf]  ;;  %vm521_vm6 = vcmask 883712   ;;  %vm584_vm7 = vcmask 752640  }
  0x12   : > { %s199_s26 = scalar_lea.vmem %s183_s25, %s877_s22  ;;  %v895_v44 = vld [vmem:[%s1159_s1 + $0x14] sm:$0xf]  ;;  %v898_v50 = vld [vmem:[%s1159_s1 + $0x18] sm:$0xf]  ;;  %vm647_vm8 = vcmask 744448   ;;  %vm710_vm9 = vcmask 736256  }
  0x13   : > { %v960_v1 = vld [vmem:[%s199_s26 + $0x8] ss:$0 sps:$4 sm:$0xff]   ;;  %v200_v2 = vld [vmem:[%s199_s26] sm:$0xff]  ;;  %v901_v58 = vld [vmem:[%s1159_s1 + $0x1c] sm:$0xf] }
  0x14   : > { %v879_v3 = vcombine.low %v200_v2, %v200_v2  ;;  %v880_v4 = vcombine.high %v200_v2, %v200_v2  ;;  %217 = vrot.lane.b32.xlu1 %v960_v1, %s1004_s27  ;;  %v904_v63 = vld [vmem:[%s1159_s1 + $0x20] sm:$0xf] }
  0x16   : > { %213 = vrot.lane.b32.xlu0 %v879_v3, %s1004_s27  ;;  %884 = vmatprep.subr.msk.bf16.mxu1 %vm226_vm0, %v880_v4  ;;  %v278_v5 = vsel %vm226_vm0, %v879_v3, 0 }
  0x17   : > { %298 = vmatpush1.bf16.msra.mxu1 %v278_v5 }
  0x18   : > { %326 = vrot.lane.b32.xlu1 %v879_v3, %s1005_s30 }
  0x1a   : > { %215 = vrot.lane.b32.xlu0 %v880_v4, %s1004_s27  ;;  %885 = vmatmul.mubr.msk.bf16.vlgmr.msra.gmra.mxu1 %vm222_vm1, %v202_v6 }
  0x1b   : > { %439 = vmatprep.mubr.bf16.mxu1 %v1003_v0 }
  0x1c   : > { %330 = vrot.lane.b32.xlu1 %v960_v1, %s1005_s30 }
  0x1e   : > { %328 = vrot.lane.b32.xlu0 %v880_v4, %s1005_s30 }
  0x20   : > { %391 = vrot.lane.b32.xlu1 %v880_v4, %s1006_s4 }
  0x22   : > { %389 = vrot.lane.b32.xlu0 %v879_v3, %s1006_s4 }
  0x24   : > { %452 = vrot.lane.b32.xlu1 %v879_v3, %s1007_s5 }
  0x26   : > { %393 = vrot.lane.b32.xlu0 %v960_v1, %s1006_s4 }
  0x28   : > { %456 = vrot.lane.b32.xlu1 %v960_v1, %s1007_s5 }
  0x2a   : > { %454 = vrot.lane.b32.xlu0 %v880_v4, %s1007_s5 }
  0x2c   : > { %517 = vrot.lane.b32.xlu1 %v880_v4, %s1008_s6 }
  0x2e   : > { %515 = vrot.lane.b32.xlu0 %v879_v3, %s1008_s6 }
  0x30   : > { %578 = vrot.lane.b32.xlu1 %v879_v3, %s1009_s7 }
  0x32   : > { %519 = vrot.lane.b32.xlu0 %v960_v1, %s1008_s6 }
  0x34   : > { %582 = vrot.lane.b32.xlu1 %v960_v1, %s1009_s7 }
  0x36   : > { %580 = vrot.lane.b32.xlu0 %v880_v4, %s1009_s7 }
  0x38   : > { %643 = vrot.lane.b32.xlu1 %v880_v4, %s1010_s8 }
  0x3a   : > { %641 = vrot.lane.b32.xlu0 %v879_v3, %s1010_s8 }
  0x3c   : > { %704 = vrot.lane.b32.xlu1 %v879_v3, %s1011_s9 }
  0x3e   : > { %645 = vrot.lane.b32.xlu0 %v960_v1, %s1010_s8  ;;  %s873_s8 = sshll.u32 %s985_s12, 1 }
  0x3f   : > { %p187_p6 = scmp.lt.s32.totalorder %s873_s8, 3 }
  0x40   : > { %708 = vrot.lane.b32.xlu1 %v960_v1, %s1011_s9 }
  0x41   : > { %s1175_s8 = smov (!%p187_p6, %s873_s8), 3 }
  0x42   : > { %706 = vrot.lane.b32.xlu0 %v880_v4, %s1011_s9  ;;  %s874_s9 = sshll.u32 %s1173_s13, 2 }
  0x43   : > { %s190_s12 = sadd.s32 %s874_s9, %s1175_s8 }
  0x44   : > { %s875_s10 = sshll.u32 %s190_s12, 3 }
  0x45   : > { %s192_s13 = scalar_lea.vmem %s1161_s3, %s875_s10 }
  0x46   : > { %768 = vperm.xlu0 %959, %v765_v7  }
  0x86   : > { %v218_v8 = vpop.permute.xlu1 %217 }
  0x88   : > { %v214_v9 = vpop.permute.xlu0 %213 }
  0x8a   : > { %v327_v10 = vpop.permute.xlu1 %326 }
  0x8c   : > { %v216_v11 = vpop.permute.xlu0 %215 }
  0x8d   : > { %v221_v12 = vsel %vm219_vm2, %v216_v11, %v218_v8  ;;  %v220_v13 = vsel %vm219_vm2, %v214_v9, %v216_v11 }
  0x8e   : > { %882 = vmatprep.subr.msk.bf16.mxu0 %vm226_vm0, %v221_v12  ;;  %v228_v14 = vsel %vm226_vm0, %v220_v13, 0  ;;  %v331_v15 = vpop.permute.xlu1 %330 }
  0x8f   : > { %248 = vmatpush1.bf16.msra.mxu0 %v228_v14 }
  0x90   : > { %v329_v17 = vpop.permute.xlu0 %328 }
  0x91   : > { %v333_v18 = vsel %vm332_vm3, %v327_v10, %v329_v17  ;;  %v334_v19 = vsel %vm332_vm3, %v329_v17, %v331_v15 }
  0x92   : > { %v339_v20 = vsel %vm226_vm0, %v333_v18, 0  ;;  %887 = vmatprep.subr.msk.bf16.mxu0 %vm226_vm0, %v334_v19  ;;  %883 = vmatmul.mubr.msk.bf16.vlgmr.msra.gmra.mxu0 %vm222_vm1, %v878_v16  ;;  %v392_v21 = vpop.permute.xlu1 %391 }
  0x93   : > { %359 = vmatpush1.bf16.msra.mxu0 %v339_v20  ;;  %376 = vmatprep.mubr.bf16.mxu0 %v1003_v0 }
  0x94   : > { %v390_v22 = vpop.permute.xlu0 %389 }
  0x95   : > { %v396_v23 = vsel %vm395_vm4, %v390_v22, %v392_v21 }
  0x96   : > { %v453_v24 = vpop.permute.xlu1 %452  ;;  %v402_v28 = vsel %vm226_vm0, %v396_v23, 0 }
  0x98   : > { %v394_v26 = vpop.permute.xlu0 %393 }
  0x99   : > { %v397_v27 = vsel %vm395_vm4, %v392_v21, %v394_v26 }
  0x9a   : > { %890 = vmatprep.subr.msk.bf16.mxu1 %vm226_vm0, %v397_v27  ;;  %888 = vmatmul.mubr.msk.bf16.vlgmr.msra.gmra.mxu0 %vm222_vm1, %v886_v25  ;;  %v457_v29 = vpop.permute.xlu1 %456 }
  0x9b   : > { %422 = vmatpush1.bf16.msra.mxu1 %v402_v28  ;;  %502 = vmatprep.mubr.bf16.mxu0 %v1003_v0 }
  0x9c   : > { %v455_v31 = vpop.permute.xlu0 %454 }
  0x9d   : > { %v459_v32 = vsel %vm458_vm5, %v453_v24, %v455_v31  ;;  %v460_v33 = vsel %vm458_vm5, %v455_v31, %v457_v29 }
  0x9e   : > { %v465_v34 = vsel %vm226_vm0, %v459_v32, 0  ;;  %893 = vmatprep.subr.msk.bf16.mxu0 %vm226_vm0, %v460_v33  ;;  %891 = vmatmul.mubr.msk.bf16.vlgmr.msra.gmra.mxu1 %vm222_vm1, %v889_v30  ;;  %v518_v35 = vpop.permute.xlu1 %517 }
  0x9f   : > { %485 = vmatpush1.bf16.msra.mxu0 %v465_v34  ;;  %565 = vmatprep.mubr.bf16.mxu1 %v1003_v0 }
  0xa0   : > { %v516_v37 = vpop.permute.xlu0 %515 }
  0xa1   : > { %v522_v38 = vsel %vm521_vm6, %v516_v37, %v518_v35 }
  0xa2   : > { %894 = vmatmul.mubr.msk.bf16.vlgmr.msra.gmra.mxu0 %vm222_vm1, %v892_v36  ;;  %v579_v39 = vpop.permute.xlu1 %578  ;;  %v528_v42 = vsel %vm226_vm0, %v522_v38, 0 }
  0xa3   : > { %628 = vmatprep.mubr.bf16.mxu0 %v1003_v0 }
  0xa4   : > { %v520_v40 = vpop.permute.xlu0 %519 }
  0xa5   : > { %v523_v41 = vsel %vm521_vm6, %v518_v35, %v520_v40 }
  0xa6   : > { %896 = vmatprep.subr.msk.bf16.mxu1 %vm226_vm0, %v523_v41  ;;  %v583_v43 = vpop.permute.xlu1 %582 }
  0xa7   : > { %548 = vmatpush1.bf16.msra.mxu1 %v528_v42 }
  0xa8   : > { %v581_v45 = vpop.permute.xlu0 %580 }
  0xa9   : > { %v585_v46 = vsel %vm584_vm7, %v579_v39, %v581_v45  ;;  %v586_v47 = vsel %vm584_vm7, %v581_v45, %v583_v43 }
  0xaa   : > { %v591_v48 = vsel %vm226_vm0, %v585_v46, 0  ;;  %897 = vmatmul.mubr.msk.bf16.vlgmr.msra.gmra.mxu1 %vm222_vm1, %v895_v44  ;;  %899 = vmatprep.subr.msk.bf16.mxu0 %vm226_vm0, %v586_v47  ;;  %v644_v49 = vpop.permute.xlu1 %643 }
  0xab   : > { %611 = vmatpush1.bf16.msra.mxu0 %v591_v48  ;;  %691 = vmatprep.mubr.bf16.mxu1 %v1003_v0 }
  0xac   : > { %v642_v51 = vpop.permute.xlu0 %641 }
  0xad   : > { %v648_v52 = vsel %vm647_vm8, %v642_v51, %v644_v49 }
  0xae   : > { %900 = vmatmul.mubr.msk.bf16.vlgmr.msra.gmra.mxu0 %vm222_vm1, %v898_v50  ;;  %v705_v53 = vpop.permute.xlu1 %704  ;;  %v654_v56 = vsel %vm226_vm0, %v648_v52, 0 }
  0xaf   : > { %754 = vmatprep.mubr.bf16.mxu0 %v1003_v0 }
  0xb0   : > { %v646_v54 = vpop.permute.xlu0 %645 }
  0xb1   : > { %v649_v55 = vsel %vm647_vm8, %v644_v49, %v646_v54 }
  0xb2   : > { %902 = vmatprep.subr.msk.bf16.mxu1 %vm226_vm0, %v649_v55  ;;  %v709_v57 = vpop.permute.xlu1 %708 }
  0xb3   : > { %674 = vmatpush1.bf16.msra.mxu1 %v654_v56 }
  0xb4   : > { %v707_v59 = vpop.permute.xlu0 %706 }
  0xb5   : > { %v711_v60 = vsel %vm710_vm9, %v705_v53, %v707_v59  ;;  %v712_v61 = vsel %vm710_vm9, %v707_v59, %v709_v57 }
  0xb6   : > { %v717_v62 = vsel %vm226_vm0, %v711_v60, 0  ;;  %903 = vmatmul.mubr.msk.bf16.vlgmr.msra.gmra.mxu1 %vm222_vm1, %v901_v58  ;;  %905 = vmatprep.subr.msk.bf16.mxu0 %vm226_vm0, %v712_v61 }
  0xb7   : > { %737 = vmatpush1.bf16.msra.mxu0 %v717_v62 }
  0xba   : > { %906 = vmatmul.mubr.msk.bf16.vlgmr.msra.gmra.mxu0 %vm222_vm1, %v904_v63 }
  0xc1   : > { %v769_v43 = vpop.permute.xlu0 %768 }
  0xda   : > { %v317_v0 = vpop.f32.mrf.mxu1 }
  0xdc   : > { %v319_v1 = vpop.f32.mrf.mxu1 }
  0xde   : > { %v321_v2 = vpop.f32.mrf.mxu1 }
  0xe0   : > { %v322_v3 = vpop.f32.mrf.mxu1 }
 0x152   : > { %v267_v4 = vpop.f32.mrf.mxu0 }
 0x153   : > { %v318_v20 = vadd.f32 %v317_v0, %v267_v4 }
 0x154   : > { %v269_v5 = vpop.f32.mrf.mxu0 }
 0x155   : > { %v320_v23 = vadd.f32 %v319_v1, %v269_v5 }
 0x156   : > { %v271_v6 = vpop.f32.mrf.mxu0 }
 0x158   : > { %v272_v7 = vpop.f32.mrf.mxu0 }
 0x15a   : > { %v378_v8 = vpop.f32.mrf.mxu0 }
 0x15b   : > { %v385_v24 = vadd.f32 %v378_v8, %v318_v20 }
 0x15c   : > { %v380_v9 = vpop.f32.mrf.mxu0 }
 0x15d   : > { %v386_v29 = vadd.f32 %v380_v9, %v320_v23 }
 0x15e   : > { %v382_v10 = vpop.f32.mrf.mxu0  ;;  %v441_v11 = vpop.f32.mrf.mxu1 }
 0x15f   : > { %v448_v30 = vadd.f32 %v441_v11, %v385_v24 }
 0x160   : > { %v383_v12 = vpop.f32.mrf.mxu0  ;;  %v443_v13 = vpop.f32.mrf.mxu1 }
 0x161   : > { %v449_v32 = vadd.f32 %v443_v13, %v386_v29 }
 0x162   : > { %v504_v14 = vpop.f32.mrf.mxu0  ;;  %v445_v15 = vpop.f32.mrf.mxu1 }
 0x163   : > { %v511_v33 = vadd.f32 %v504_v14, %v448_v30 }
 0x164   : > { %v506_v16 = vpop.f32.mrf.mxu0  ;;  %v446_v17 = vpop.f32.mrf.mxu1 }
 0x165   : > { %v512_v35 = vadd.f32 %v506_v16, %v449_v32 }
 0x166   : > { %v508_v18 = vpop.f32.mrf.mxu0 }
 0x168   : > { %v509_v19 = vpop.f32.mrf.mxu0 }
 0x16a   : > { %v567_v21 = vpop.f32.mrf.mxu1 }
 0x16b   : > { %v574_v36 = vadd.f32 %v567_v21, %v511_v33 }
 0x16c   : > { %v569_v22 = vpop.f32.mrf.mxu1 }
 0x16d   : > { %v575_v38 = vadd.f32 %v569_v22, %v512_v35 }
 0x16e   : > { %v630_v25 = vpop.f32.mrf.mxu0  ;;  %v571_v26 = vpop.f32.mrf.mxu1 }
 0x16f   : > { %v637_v39 = vadd.f32 %v630_v25, %v574_v36 }
 0x170   : > { %v632_v27 = vpop.f32.mrf.mxu0  ;;  %v572_v28 = vpop.f32.mrf.mxu1 }
 0x171   : > { %v638_v41 = vadd.f32 %v632_v27, %v575_v38 }
 0x172   : > { %v634_v31 = vpop.f32.mrf.mxu0 }
 0x174   : > { %v635_v34 = vpop.f32.mrf.mxu0 }
 0x176   : > { %v693_v37 = vpop.f32.mrf.mxu1 }
 0x177   : > { %v700_v42 = vadd.f32 %v693_v37, %v637_v39 }
 0x178   : > { %v695_v40 = vpop.f32.mrf.mxu1 }
 0x179   : > { %v701_v46 = vadd.f32 %v695_v40, %v638_v41 }
 0x17a   : > { %v756_v44 = vpop.f32.mrf.mxu0  ;;  %v697_v45 = vpop.f32.mrf.mxu1 }
 0x17b   : > { %v763_v47 = vadd.f32 %v756_v44, %v700_v42 }
 0x17c   : > { %v758_v48 = vpop.f32.mrf.mxu0  ;;  %v698_v49 = vpop.f32.mrf.mxu1 }
 0x17d   : > { %v764_v50 = vadd.f32 %v758_v48, %v701_v46  ;;  %v771_v51 = vadd.f32 %v769_v43, %v763_v47 }
 0x17e   : > { %v760_v52 = vpop.f32.mrf.mxu0 }
 0x17f   : > { %v772_v53 = vadd.f32 %v769_v43, %v764_v50  ;;  %vm773_vm10 = vcmp.ge.f32.partialorder %v771_v51, 0.0  ;;  %v775_v54 = vmul.f32 0.2, %v771_v51 }
 0x180   : > { %v761_v55 = vpop.f32.mrf.mxu0 }
 0x181   : > { %vm774_vm11 = vcmp.ge.f32.partialorder %v772_v53, 0.0  ;;  %v776_v56 = vmul.f32 0.2, %v772_v53  ;;  %v777_v57 = vsel %vm773_vm10, %v771_v51, %v775_v54 }
 0x182   : > { %779 = vst [vmem:[%s192_s13] sm:$0xff] %v777_v57 }
 0x183   : > { %v778_v58 = vsel %vm774_vm11, %v772_v53, %v776_v56 }
 0x184   : > { %780 = vst [vmem:[%s192_s13 + $0x8] sm:$0xff] %v778_v58 }
 0x185 PF: > { %s13_s16 = sadd.s32 1, %s1001_s16   ;;  %s1162_s12 = smov %s993_s14 }
 0x186   : > { %p10_p7 = scmp.ge.s32.totalorder %s13_s16, 6   ;;  %s1163_s13 = smov %s997_s15 }
 0x187   : > { %s1164_s14 = smov %s1167_s17  ;;  %s1165_s15 = smov %s1171_s18 }
 0x188   :  { %12 = sbr.rel (!%p10_p7) target bundleno = 3 (0x3), region = 71 }

</bundles_post_ra>
